<compile_context>
chip_gen: v7x
topology: tpu7x:2x2x1
jax: 0.10.0
libtpu: 0.0.40
codegen_flags: <defaults>
</compile_context>

<pallas_src>
import functools

import jax
import jax.numpy as jnp
from jax import lax
from jax.experimental import pallas as pl
from jax.experimental.pallas import tpu as pltpu


def _round_up(x, m):
    return ((x + m - 1) // m) * m


def _chamfer_kernel(a1_ref, a2_ref, out_ref, minrow_ref, colsum_ref, *,
                    n_points, n2_padded):
    """Grid = (batch_blocks ["parallel"], n2_blocks ["arbitrary"]).

    a1_ref    : (bb, F, N1)   all of array1 for this batch block, N lane-dense
    a2_ref    : (bb, F, tn2)  one N2 tile of array2, tn2 lane-dense
    out_ref   : (1, 2, bb)    row 0 = av_dist1, row 1 = av_dist2 (lane = batch)
    minrow_ref: (N1, bb)      running min over N2  -> av_dist2
    colsum_ref: (1, bb)       running sum of per-column mins -> av_dist1
    """
    j = pl.program_id(1)
    bb, nf, n1 = a1_ref.shape
    tn2 = a2_ref.shape[2]

    @pl.when(j == 0)
    def _init():
        minrow_ref[...] = jnp.full(minrow_ref.shape, jnp.inf, dtype=jnp.float32)
        colsum_ref[...] = jnp.zeros(colsum_ref.shape, jnp.float32)

    if n2_padded:
        col = j * tn2 + lax.broadcasted_iota(jnp.int32, (1, tn2), 1)
        valid = col < n_points                        # (1, tn2)
    else:
        valid = None

    # K = F contraction with a transposed LHS: (F, M)^T @ (F, N) on the MXU.
    trans_lhs_dims = (((0,), (0,)), ((), ()))
    ones_col = jnp.ones((nf, 1), jnp.float32)

    # Batch block is small (<= 8) and static: unroll into 2-D MXU matmuls.
    for b in range(bb):
        a1 = a1_ref[b].astype(jnp.float32)            # (F, N1)
        a2 = a2_ref[b].astype(jnp.float32)            # (F, tn2)

        cross = lax.dot_general(a1, a2, trans_lhs_dims,
                                preferred_element_type=jnp.float32)  # (N1, tn2)
        # ||a1||^2 as a column without a lane->sublane relayout: tiny matmul
        # against a ones column (also on the otherwise idle MXU).
        sq1 = lax.dot_general(a1 * a1, ones_col, trans_lhs_dims,
                              preferred_element_type=jnp.float32)    # (N1, 1)
        sq2 = jnp.sum(a2 * a2, axis=0, keepdims=True)                # (1, tn2)
        d = jnp.maximum(sq1 + sq2 - 2.0 * cross, 0.0)                # (N1, tn2)

        col_min = jnp.min(d, axis=0, keepdims=True)                  # (1, tn2)
        if valid is not None:
            col_min = jnp.where(valid, col_min, 0.0)
            d = jnp.where(valid, d, jnp.inf)
        row_min = jnp.min(d, axis=1, keepdims=True)                  # (N1, 1)

        minrow_ref[:, b:b + 1] = jnp.minimum(minrow_ref[:, b:b + 1], row_min)
        colsum_ref[:, b:b + 1] = (colsum_ref[:, b:b + 1]
                                  + jnp.sum(col_min, axis=1, keepdims=True))

    @pl.when(j == pl.num_programs(1) - 1)
    def _finalize():
        inv_n = jnp.float32(1.0 / n_points)
        out_ref[0, 0:1, :] = colsum_ref[...] * inv_n                 # av_dist1
        out_ref[0, 1:2, :] = jnp.mean(minrow_ref[...], axis=0,
                                      keepdims=True)                 # av_dist2


def _vmem_budget_and_limit():
    """Generation-aware working-set budget and explicit scoped-VMEM limit."""
    try:
        cap = int(pltpu.get_tpu_info().vmem_capacity_bytes)
    except Exception:
        cap = 64 << 20          # conservative: v7x has 64 MiB per TensorCore
    # ~60% of physical VMEM as working set, ~75% as the scoped limit:
    # v5e/v6e (128 MiB) -> ~77 / 96 MiB,  v7x (64 MiB) -> ~38 / 48 MiB.
    return (cap * 3) // 5, (cap * 3) // 4


def point_loss_test(array1, array2, *, batch_block=None, n2_block=None):
    """Pallas implementation of PointLoss_test.forward.

    Returns (dist_all * 100, dist1, dist2) as float32 scalars, matching
    chamfer_distance_numpy_test semantics.
    """
    B, N, F = array1.shape
    assert array2.shape == (B, N, F)

    # Native dtype for the HBM->VMEM DMA; the kernel upcasts to f32.
    a1t = jnp.transpose(array1, (0, 2, 1))           # (B, F, N), N lane-dense
    a2t = jnp.transpose(array2, (0, 2, 1))           # (B, F, N)

    itemsize = jnp.dtype(array1.dtype).itemsize
    budget, vmem_limit = _vmem_budget_and_limit()

    def per_batch_bytes(tn2):
        # (8,128)-padded, double-buffered input blocks + f32 intermediates.
        f_sub = _round_up(F, 8)
        return (2 * f_sub * _round_up(N, 128) * itemsize           # a1 block x2
                + 2 * f_sub * _round_up(tn2, 128) * itemsize       # a2 block x2
                + 4 * _round_up(N, 8) * _round_up(tn2, 128) * 4)   # cross/d temps

    # Scratch (minrow (N, bb<=128 lanes) + colsum) is bb-independent here.
    scratch_bytes = _round_up(N, 8) * 128 * 4 + 8 * 128 * 4

    # ---- N2 tile: inner "arbitrary" grid axis with an online min. ----------
    if n2_block is None:
        tn2 = N
        if N > 512 and per_batch_bytes(N) + scratch_bytes > budget:
            tn2 = 512                      # multiple of 256 (v6e/v7x) and 128 (v5e)
    else:
        tn2 = max(1, min(int(n2_block), N))
    if tn2 < N:
        tn2 = min(_round_up(tn2, 128), N)  # lane-aligned tiles unless full-N
    n2_pad = _round_up(N, tn2)
    n2_blocks = n2_pad // tn2
    if n2_pad != N:
        a2t = jnp.pad(a2t, ((0, 0), (0, 0), (0, n2_pad - N)))

    # ---- Batch block: biggest that fits the budget, capped at 8 (the batch
    # loop is statically unrolled) and so the "parallel" axis keeps >= 2
    # blocks whenever B >= 2 (v7x has 2 TensorCores to shard it across). -----
    if batch_block is None:
        avail = max(budget - scratch_bytes, 0)
        bb = max(1, min(B, avail // max(per_batch_bytes(tn2), 1), 8))
    else:
        bb = max(1, min(B, int(batch_block)))
    if B >= 2:
        bb = min(bb, -(-B // 2))
    n_bblocks = -(-B // bb)
    b_pad = n_bblocks * bb
    if b_pad != B:
        a1t = jnp.pad(a1t, ((0, b_pad - B), (0, 0), (0, 0)))
        a2t = jnp.pad(a2t, ((0, b_pad - B), (0, 0), (0, 0)))

    # TODO(synk): very large N additionally needs tiling along N1 (the full
    # (F, N1) block and the (N1, tn2) distance tile are kept resident here).

    kernel = functools.partial(_chamfer_kernel, n_points=N,
                               n2_padded=(n2_pad != N))

    out = pl.pallas_call(
        kernel,
        out_shape=jax.ShapeDtypeStruct((n_bblocks, 2, bb), jnp.float32),
        grid_spec=pltpu.PrefetchScalarGridSpec(
            num_scalar_prefetch=0,
            grid=(n_bblocks, n2_blocks),
            in_specs=[
                pl.BlockSpec((bb, F, N), lambda i, j: (i, 0, 0)),
                pl.BlockSpec((bb, F, tn2), lambda i, j: (i, 0, j)),
            ],
            out_specs=pl.BlockSpec((1, 2, bb), lambda i, j: (i, 0, 0)),
            scratch_shapes=[
                pltpu.VMEM((N, bb), jnp.float32),    # running min over N2
                pltpu.VMEM((1, bb), jnp.float32),    # running sum of col mins
            ],
        ),
        compiler_params=pltpu.CompilerParams(
            dimension_semantics=("parallel", "arbitrary"),
            vmem_limit_bytes=int(vmem_limit),
        ),
    )(a1t, a2t)

    av1 = out[:, 0, :].reshape(-1)[:B]               # per-batch av_dist1
    av2 = out[:, 1, :].reshape(-1)[:B]               # per-batch av_dist2
    dist1 = jnp.mean(av1)
    dist2 = jnp.mean(av2)
    dist_all = (dist1 + dist2) * 100.0
    return dist_all, dist1, dist2


def _reference(array1, array2):
    """Pure-JAX reference mirroring the PyTorch code."""
    a1 = array1.astype(jnp.float32)
    a2 = array2.astype(jnp.float32)
    diff = a1[:, :, None, :] - a2[:, None, :, :]          # (B, N1, N2, F)
    d = jnp.sum(diff * diff, axis=-1)                     # (B, N1, N2)
    av1 = jnp.mean(jnp.min(d, axis=1), axis=-1)           # per-batch av_dist1
    av2 = jnp.mean(jnp.min(d, axis=2), axis=-1)           # per-batch av_dist2
    dist1 = jnp.mean(av1)
    dist2 = jnp.mean(av2)
    return (dist1 + dist2) * 100.0, dist1, dist2


if __name__ == "__main__":
    key = jax.random.PRNGKey(0)
    k1, k2, k3, k4 = jax.random.split(key, 4)

    # Small point clouds consistent with the module: batch=2, 16 points, xyz.
    B, N, F = 2, 16, 3
    array1 = jax.random.normal(k1, (B, N, F), dtype=jnp.float32)
    array2 = jax.random.normal(k2, (B, N, F), dtype=jnp.float32)
    out = jax.block_until_ready(point_loss_test(array1, array2))
    ref = _reference(array1, array2)
    for o, r in zip(out, ref):
        assert jnp.allclose(o, r, rtol=1e-4, atol=1e-5), (o, r)

    # Also exercise the online-min N2 tiling (masked padded tile) and batch
    # padding on a slightly larger, still small problem.
    B2, N2, F2 = 3, 160, 3
    b1 = jax.random.normal(k3, (B2, N2, F2), dtype=jnp.float32)
    b2 = jax.random.normal(k4, (B2, N2, F2), dtype=jnp.float32)
    out2 = jax.block_until_ready(point_loss_test(b1, b2, n2_block=128))
    ref2 = _reference(b1, b2)
    for o, r in zip(out2, ref2):
        assert jnp.allclose(o, r, rtol=1e-4, atol=1e-4), (o, r)

    print("KERNEL_OK")
</pallas_src>

<mosaic_0001>
module attributes {stable_mosaic.version = 11 : i64} {
  func.func @_chamfer_kernel(%arg0: i32, %arg1: i32, %arg2: memref<1x3x16xf32, #tpu.memory_space<vmem>>, %arg3: memref<1x3x16xf32, #tpu.memory_space<vmem>>, %arg4: memref<1x2x1xf32, #tpu.memory_space<vmem>>, %arg5: memref<16x1xf32, #tpu.memory_space<vmem>>, %arg6: memref<1x1xf32, #tpu.memory_space<vmem>>) attributes {dimension_semantics = [#tpu.dimension_semantics<parallel>, #tpu.dimension_semantics<arbitrary>], iteration_bounds = array<i64: 2, 1>, scalar_prefetch = 0 : i64, scratch_operands = 2 : i64, tpu.core_type = #tpu.core_type<tc>, window_params = [{transform_indices = @transform_0, window_bounds = array<i64: 1, 3, 16>}, {transform_indices = @transform_1, window_bounds = array<i64: 1, 3, 16>}, {transform_indices = @transform_2, window_bounds = array<i64: 1, 2, 1>}]} {
    %c0_i32 = arith.constant 0 : i32
    %0 = arith.cmpi eq, %arg1, %c0_i32 : i32
    %1 = arith.extui %0 : i1 to i32
    %c0_i32_0 = arith.constant 0 : i32
    %2 = arith.cmpi ne, %1, %c0_i32_0 : i32
    scf.if %2 {
      %cst_24 = arith.constant 0x7F800000 : f32
      %37 = vector.broadcast %cst_24 : f32 to vector<16x1xf32>
      %c0_25 = arith.constant 0 : index
      %c0_26 = arith.constant 0 : index
      %38 = vector.load %arg5[%c0_25, %c0_26] : memref<16x1xf32, #tpu.memory_space<vmem>>, vector<16x1xf32>
      tpu.vector_store %arg5[%c0_25, %c0_26], %37 {strides = array<i32>} : memref<16x1xf32, #tpu.memory_space<vmem>>, vector<16x1xf32>,
      %cst_27 = arith.constant 0.000000e+00 : f32
      %39 = vector.broadcast %cst_27 : f32 to vector<1x1xf32>
      %c0_28 = arith.constant 0 : index
      %c0_29 = arith.constant 0 : index
      %40 = vector.load %arg6[%c0_28, %c0_29] : memref<1x1xf32, #tpu.memory_space<vmem>>, vector<1x1xf32>
      tpu.vector_store %arg6[%c0_28, %c0_29], %39 {strides = array<i32>} : memref<1x1xf32, #tpu.memory_space<vmem>>, vector<1x1xf32>,
    } else {
    }
    %cst = arith.constant 1.000000e+00 : f32
    %3 = vector.broadcast %cst : f32 to vector<3x1xf32>
    %c0 = arith.constant 0 : index
    %c0_1 = arith.constant 0 : index
    %c0_2 = arith.constant 0 : index
    %4 = vector.load %arg2[%c0, %c0_1, %c0_2] : memref<1x3x16xf32, #tpu.memory_space<vmem>>, vector<1x3x16xf32>
    %5 = vector.shape_cast %4 : vector<1x3x16xf32> to vector<3x16xf32>
    %c0_3 = arith.constant 0 : index
    %c0_4 = arith.constant 0 : index
    %c0_5 = arith.constant 0 : index
    %6 = vector.load %arg3[%c0_3, %c0_4, %c0_5] : memref<1x3x16xf32, #tpu.memory_space<vmem>>, vector<1x3x16xf32>
    %7 = vector.shape_cast %6 : vector<1x3x16xf32> to vector<3x16xf32>
    %cst_6 = arith.constant dense<0.000000e+00> : vector<16x16xf32>
    %8 = tpu.matmul %5, %7, %cst_6 {dimension_numbers = #tpu.dot_dimension_numbers<[0], [0], [1], [1], [0, 1, 1, 1], [], []>} : vector<3x16xf32>, vector<3x16xf32>, vector<16x16xf32> -> vector<16x16xf32>
    %9 = arith.mulf %5, %5 : vector<3x16xf32>
    %cst_7 = arith.constant dense<0.000000e+00> : vector<16x1xf32>
    %10 = tpu.matmul %9, %3, %cst_7 {dimension_numbers = #tpu.dot_dimension_numbers<[0], [0], [1], [1], [0, 1, 1, 1], [], []>} : vector<3x16xf32>, vector<3x1xf32>, vector<16x1xf32> -> vector<16x1xf32>
    %11 = arith.mulf %7, %7 : vector<3x16xf32>
    %cst_8 = arith.constant dense<0.000000e+00> : vector<16xf32>
    %12 = vector.multi_reduction <add>, %11, %cst_8 [0] : vector<3x16xf32> to vector<16xf32>
    %13 = vector.shape_cast %12 : vector<16xf32> to vector<1x16xf32>
    %14 = vector.broadcast %10 : vector<16x1xf32> to vector<16x16xf32>
    %15 = vector.broadcast %13 : vector<1x16xf32> to vector<16x16xf32>
    %16 = arith.addf %14, %15 : vector<16x16xf32>
    %cst_9 = arith.constant 2.000000e+00 : f32
    %17 = vector.broadcast %cst_9 : f32 to vector<16x16xf32>
    %18 = arith.mulf %17, %8 : vector<16x16xf32>
    %19 = arith.subf %16, %18 : vector<16x16xf32>
    %cst_10 = arith.constant 0.000000e+00 : f32
    %20 = vector.broadcast %cst_10 : f32 to vector<16x16xf32>
    %21 = arith.maximumf %19, %20 : vector<16x16xf32>
    %cst_11 = arith.constant dense<0x7F800000> : vector<16xf32>
    %22 = vector.multi_reduction <minimumf>, %21, %cst_11 [0] : vector<16x16xf32> to vector<16xf32>
    %23 = vector.shape_cast %22 : vector<16xf32> to vector<1x16xf32>
    %cst_12 = arith.constant dense<0x7F800000> : vector<16xf32>
    %24 = vector.multi_reduction <minimumf>, %21, %cst_12 [1] : vector<16x16xf32> to vector<16xf32>
    %25 = vector.shape_cast %24 : vector<16xf32> to vector<16x1xf32>
    %c0_13 = arith.constant 0 : index
    %c0_14 = arith.constant 0 : index
    %26 = vector.load %arg5[%c0_13, %c0_14] : memref<16x1xf32, #tpu.memory_space<vmem>>, vector<16x1xf32>
    %27 = arith.minimumf %26, %25 : vector<16x1xf32>
    %c0_15 = arith.constant 0 : index
    %c0_16 = arith.constant 0 : index
    %28 = vector.load %arg5[%c0_15, %c0_16] : memref<16x1xf32, #tpu.memory_space<vmem>>, vector<16x1xf32>
    tpu.vector_store %arg5[%c0_15, %c0_16], %27 {strides = array<i32>} : memref<16x1xf32, #tpu.memory_space<vmem>>, vector<16x1xf32>,
    %c0_17 = arith.constant 0 : index
    %c0_18 = arith.constant 0 : index
    %29 = vector.load %arg6[%c0_17, %c0_18] : memref<1x1xf32, #tpu.memory_space<vmem>>, vector<1x1xf32>
    %cst_19 = arith.constant dense<0.000000e+00> : vector<1xf32>
    %30 = vector.multi_reduction <add>, %23, %cst_19 [1] : vector<1x16xf32> to vector<1xf32>
    %31 = vector.shape_cast %30 : vector<1xf32> to vector<1x1xf32>
    %32 = arith.addf %29, %31 : vector<1x1xf32>
    %c0_20 = arith.constant 0 : index
    %c0_21 = arith.constant 0 : index
    %33 = vector.load %arg6[%c0_20, %c0_21] : memref<1x1xf32, #tpu.memory_space<vmem>>, vector<1x1xf32>
    tpu.vector_store %arg6[%c0_20, %c0_21], %32 {strides = array<i32>} : memref<1x1xf32, #tpu.memory_space<vmem>>, vector<1x1xf32>,
    %c0_i32_22 = arith.constant 0 : i32
    %34 = arith.cmpi eq, %arg1, %c0_i32_22 : i32
    %35 = arith.extui %34 : i1 to i32
    %c0_i32_23 = arith.constant 0 : i32
    %36 = arith.cmpi ne, %35, %c0_i32_23 : i32
    scf.if %36 {
      %c0_24 = arith.constant 0 : index
      %c0_25 = arith.constant 0 : index
      %37 = vector.load %arg6[%c0_24, %c0_25] : memref<1x1xf32, #tpu.memory_space<vmem>>, vector<1x1xf32>
      %cst_26 = arith.constant 6.250000e-02 : f32
      %38 = vector.broadcast %cst_26 : f32 to vector<1x1xf32>
      %39 = arith.mulf %37, %38 : vector<1x1xf32>
      %c0_27 = arith.constant 0 : index
      %c0_28 = arith.constant 0 : index
      %c0_29 = arith.constant 0 : index
      %40 = vector.load %arg4[%c0_27, %c0_28, %c0_29] : memref<1x2x1xf32, #tpu.memory_space<vmem>>, vector<1x1x1xf32>
      %41 = vector.shape_cast %40 : vector<1x1x1xf32> to vector<1x1xf32>
      %42 = vector.shape_cast %39 : vector<1x1xf32> to vector<1x1x1xf32>
      tpu.vector_store %arg4[%c0_27, %c0_28, %c0_29], %42 {strides = array<i32>} : memref<1x2x1xf32, #tpu.memory_space<vmem>>, vector<1x1x1xf32>,
      %c0_30 = arith.constant 0 : index
      %c0_31 = arith.constant 0 : index
      %43 = vector.load %arg5[%c0_30, %c0_31] : memref<16x1xf32, #tpu.memory_space<vmem>>, vector<16x1xf32>
      %cst_32 = arith.constant dense<0.000000e+00> : vector<1xf32>
      %44 = vector.multi_reduction <add>, %43, %cst_32 [0] : vector<16x1xf32> to vector<1xf32>
      %45 = vector.shape_cast %44 : vector<1xf32> to vector<1x1xf32>
      %cst_33 = arith.constant 1.600000e+01 : f32
      %46 = vector.broadcast %cst_33 : f32 to vector<1x1xf32>
      %47 = arith.divf %45, %46 : vector<1x1xf32>
      %c0_34 = arith.constant 0 : index
      %c1 = arith.constant 1 : index
      %c0_35 = arith.constant 0 : index
      %48 = vector.load %arg4[%c0_34, %c1, %c0_35] : memref<1x2x1xf32, #tpu.memory_space<vmem>>, vector<1x1x1xf32>
      %49 = vector.shape_cast %48 : vector<1x1x1xf32> to vector<1x1xf32>
      %50 = vector.shape_cast %47 : vector<1x1xf32> to vector<1x1x1xf32>
      tpu.vector_store %arg4[%c0_34, %c1, %c0_35], %50 {strides = array<i32>} : memref<1x2x1xf32, #tpu.memory_space<vmem>>, vector<1x1x1xf32>,
    } else {
    }
    return
  }
  func.func @transform_0(%arg0: i32, %arg1: i32) -> (i32, i32, i32) {
    %c0_i32 = arith.constant 0 : i32
    %c0_i32_0 = arith.constant 0 : i32
    %c0_i32_1 = arith.constant 0 : i32
    return %arg0, %c0_i32, %c0_i32_0 : i32, i32, i32
  }
  func.func @transform_1(%arg0: i32, %arg1: i32) -> (i32, i32, i32) {
    %c0_i32 = arith.constant 0 : i32
    %c0_i32_0 = arith.constant 0 : i32
    return %arg0, %c0_i32, %arg1 : i32, i32, i32
  }
  func.func @transform_2(%arg0: i32, %arg1: i32) -> (i32, i32, i32) {
    %c0_i32 = arith.constant 0 : i32
    %c0_i32_0 = arith.constant 0 : i32
    %c0_i32_1 = arith.constant 0 : i32
    return %arg0, %c0_i32, %c0_i32_0 : i32, i32, i32
  }
}

</mosaic_0001>

<bundles_post_ra>
// kernel: tpu_custom_call.1
= control target key start
LH: loop header
LB: loop body
LE: loop exit
PB: predicated region body
PF: predicated region fallthrough
CT: control target
= control target key end

     0   :  { %s681_s9 = smov 0   ;;  %s683_s10 = smov 0   ;;  %s734_s0 = inlined_call_operand.vmem [shape: f32[2,3,16], index: 0, kind: input, shape index: {}]   ;;  %s735_s1 = inlined_call_operand.vmem [shape: f32[2,3,16], index: 1, kind: input, shape index: {}]   ;;  %s736_s2 = inlined_call_operand.vmem [shape: f32[2,2,1], index: 2, kind: output, shape index: {}]  }
   0x1   :  { %s685_s11 = smov 0  }
   0x2 LB: > { %s24_s12 = sadd.s32 1, %s656_s10  ;;  %p580_p0 = scmp.ge.s32.totalorder %s660_s11, 1  ;;  %s660_s11 = sphi %s685_s11, %s12_s11   ;;  %s656_s10 = sphi %s683_s10, %s738_s10   ;;  %s652_s9 = sphi %s681_s9, %s737_s9  }
   0x3   : > { %p26_p1 = scmp.ge.s32.totalorder %s24_s12, 2  ;;  %p137_p2 = scmp.lt.s32.totalorder %s660_s11, 3 }
   0x5   : > { %s740_s12 = smov (%p26_p1, %s24_s12), 0  ;;  %p138_p3 = pnand %p580_p0, %p137_p2 }
   0x6   : > { %p164_p4 = scmp.lt.s32.totalorder (!%p138_p3), %s652_s9, 1  ;;  %vm229_vm0 = vcmask (!%p138_p3), 1042432   ;;  %v662_v2 = vmov (!%p138_p3), 1.0   ;;  %vm222_vm1 = vcmask (!%p138_p3), 23552   ;;  %v663_v8 = vmov (!%p138_p3), 0  }
   0x7   : > { %141 = sbr.rel (%p138_p3) target bundleno = 675 (0x2a3), region = 28  ;;  %603 = vmatprep.subr.msk.mxu1 (!%p138_p3), %vm229_vm0, %v662_v2  ;;  %636 = vset.pattern.permute.xlu1 (!%p138_p3), %v663_v8  ;;  %vm183_vm2 = vcmask (!%p138_p3), 7168   ;;  %v664_v13 = vmov (!%p138_p3), inf   ;;  %vm426_vm3 = vcmask (!%p138_p3), 124928   ;;  %vm452_vm4 = vcmask (!%p138_p3), 130048  }
   0x8   : > { %604 = vmatpush3.msk.msra.mxu1 (!%p138_p3), %vm229_vm0, %v662_v2  ;;  %184 = vst.msk [vmem:[#allocation2] sm:$0xff] (!%p138_p3), %vm183_vm2, %v664_v13  ;;  %185 = vst.msk [vmem:[#allocation2 + $0x8] sm:$0xff] (!%p138_p3), %vm183_vm2, %v664_v13  ;;  %vm186_vm5 = vcmask (!%p138_p3), 0   ;;  %v665_v42 = vmov (!%p138_p3), 0.0  }
   0x9   : > { %187 = vst.msk [vmem:[#allocation3] sm:$0x1] (!%p138_p3), %vm186_vm5, %v665_v42 }
   0xe   : > { %s742_s9 = smov (!%p164_p4, %s652_s9), 1 }
   0xf   : > { %s581_s13 = sshll.u32 %s742_s9, 2  ;;  %v466_v43 = vld [vmem:[#allocation2] sm:$0xff]  ;;  %v467_v46 = vld [vmem:[#allocation2 + $0x8] sm:$0xff]  ;;  %s583_s20 = sshll.u32 %s742_s9, 1 }
  0x10   : > { %s167_s16 = scalar_lea.vmem %s734_s0, %s581_s13  ;;  %s174_s19 = scalar_lea.vmem %s735_s1, %s581_s13  ;;  %v473_v54 = vld [vmem:[#allocation3] sm:$0x1] }
  0x11   : > { %v188_v0 = vld [vmem:[%s167_s16] sm:$0x7]  ;;  %s178_s23 = scalar_lea.vmem %s736_s2, %s583_s20 }
  0x12   : > { %v308_v1 = vmul.f32 %v188_v0, %v188_v0  ;;  %v189_v3 = vld [vmem:[%s174_s19] sm:$0x7] }
  0x13   : > { %598 = vmatprep.subr.msk.mxu0 %vm229_vm0, %v189_v3  ;;  %v425_v14 = vmul.f32 %v189_v3, %v189_v3 }
  0x14   : > { %309 = vxpose.xlu0.b32.start.end [1/1] (short) (narrow) %v308_v1, 16  ;;  %599 = vmatpush3.msk.msra.mxu0 %vm229_vm0, %v189_v3 }
  0x15   : > { %v427_v15 = vsel %vm426_vm3, %v425_v14, 0.0 }
  0x16   : > { %v428_v16 = vrot.slane %v427_v15, 4 }
  0x18   : > { %v429_v17 = vadd.f32 %v428_v16, %v427_v15 }
  0x19   : > { %190 = vxpose.xlu0.b32.start.end [1/1] (short) (narrow) %v188_v0, 16 }
  0x1a   : > { %v430_v18 = vrot.slane %v429_v17, 2 }
  0x1c   : > { %v431_v19 = vadd.f32 %v430_v18, %v429_v17 }
  0x1e   : > { %v432_v20 = vrot.slane %v431_v19, 1 }
  0x20   : > { %v433_v21 = vadd.f32 %v432_v20, %v431_v19 }
  0x42   : > { %637 = vset.pattern.permute.xlu0 %v663_v8 }
  0x94   : > { %v325_v4 = vpop.trf.xlu0 }
  0x95   : > { %605 = vmatprep.mubr.msk.f32.mxu1 %vm222_vm1, %v325_v4 }
  0x98   : > { %v326_v5 = vpop.trf.xlu0 }
  0x99   : > { %606 = vmatmul.mubr.msk.f32.vlgmr.msra.gmra.mrb[0].mxu1 %vm222_vm1, %v326_v5 }
  0x9c   : > { %v206_v6 = vpop.trf.xlu0 }
  0x9d   : > { %600 = vmatprep.mubr.msk.f32.mxu0 %vm222_vm1, %v206_v6 }
  0xa0   : > { %v207_v7 = vpop.trf.xlu0 }
  0xa1   : > { %601 = vmatmul.mubr.msk.f32.vlgmr.msra.gmra.mrb[0].mxu0 %vm222_vm1, %v207_v7 }
 0x16c   : > { %v607_v9 = vpop.f32.mrb[0].mxu1 }
 0x16d   : > { %v416_v10 = vpop.f32.mrb[1].mxu1 }
 0x16e   : > { %436 = vperm.xlu1 %636, %v416_v10  }
 0x172   : > { %441 = vperm.xlu1 %636, %v607_v9  }
 0x174   : > { %v602_v11 = vpop.f32.mrb[0].mxu0 }
 0x175   : > { %v299_v12 = vpop.f32.mrb[1].mxu0  ;;  %v447_v25 = vmul.f32 2.0, %v602_v11 }
 0x176   : > { %v446_v22 = vmul.f32 2.0, %v299_v12 }
 0x1ed   : > { %v437_v23 = vpop.permute.xlu1 %436 }
 0x1ee   : > { %v444_v24 = vadd.f32 %v437_v23, %v433_v21 }
 0x1f0   : > { %v448_v26 = vsub.f32 %v444_v24, %v446_v22 }
 0x1f1   : > { %v442_v27 = vpop.permute.xlu1 %441 }
 0x1f2   : > { %v450_v28 = vmax.f32 %v448_v26, 0.0  ;;  %v445_v29 = vadd.f32 %v442_v27, %v433_v21 }
 0x1f4   : > { %v449_v30 = vsub.f32 %v445_v29, %v447_v25  ;;  %v453_v31 = vsel %vm452_vm4, %v450_v28, inf }
 0x1f5   : > { %462 = vmin.xlane.f32.xlu1 %v453_v31 }
 0x1f6   : > { %v451_v32 = vmax.f32 %v449_v30, 0.0 }
 0x1f8   : > { %v454_v33 = vsel %vm452_vm4, %v451_v32, inf }
 0x1f9   : > { %464 = vmin.xlane.f32.xlu0 %v454_v33  ;;  %v455_v34 = vmin.f32 %v453_v31, %v454_v33 }
 0x1fb   : > { %v456_v35 = vrot.slane %v455_v34, 4 }
 0x1fd   : > { %v457_v36 = vmin.f32 %v455_v34, %v456_v35 }
 0x1ff   : > { %v458_v37 = vrot.slane %v457_v36, 2 }
 0x201   : > { %v459_v38 = vmin.f32 %v457_v36, %v458_v37 }
 0x203   : > { %v460_v39 = vrot.slane %v459_v38, 1 }
 0x205   : > { %v461_v40 = vmin.f32 %v459_v38, %v460_v39 }
 0x207   : > { %v474_v41 = vsel %vm452_vm4, %v461_v40, 0.0 }
 0x208   : > { %475 = vadd.xlane.f32.xlu1 %v474_v41 }
 0x282   : > { %v463_v44 = vpop.xlane.xlu1 %462 }
 0x283   : > { %v468_v45 = vmin.f32 %v466_v43, %v463_v44 }
 0x285   : > { %471 = vst.msk [vmem:[#allocation2] sm:$0xff] %vm183_vm2, %v468_v45 }
 0x286   : > { %v465_v47 = vpop.xlane.xlu0 %464 }
 0x287   : > { %v469_v48 = vmin.f32 %v467_v46, %v465_v47 }
 0x289   : > { %472 = vst.msk [vmem:[#allocation2 + $0x8] sm:$0xff] %vm183_vm2, %v469_v48 }
 0x28c   : > { %v486_v49 = vld [vmem:[#allocation2] sm:$0xff] }
 0x28d   : > { %v488_v51 = vsel %vm183_vm2, %v486_v49, 0.0 }
 0x290   : > { %v487_v50 = vld [vmem:[#allocation2 + $0x8] sm:$0xff] }
 0x291   : > { %v489_v52 = vsel %vm183_vm2, %v487_v50, 0.0 }
 0x292   : > { %v490_v53 = vadd.f32 %v489_v52, %v488_v51 }
 0x294   : > { %v491_v55 = vrot.slane %v490_v53, 4 }
 0x295   : > { %v476_v56 = vpop.xlane.xlu1 %475 }
 0x296   : > { %v492_v57 = vadd.f32 %v491_v55, %v490_v53  ;;  %v477_v58 = vadd.f32 %v476_v56, %v473_v54 }
 0x298   : > { %v493_v59 = vrot.slane %v492_v57, 2  ;;  %479 = vst.msk [vmem:[#allocation3] sm:$0x1] %vm186_vm5, %v477_v58 }
 0x29a   : > { %v494_v60 = vadd.f32 %v493_v59, %v492_v57 }
 0x29c   : > { %v495_v61 = vrot.slane %v494_v60, 1 }
 0x29e   : > { %v496_v62 = vadd.f32 %v495_v61, %v494_v60 }
 0x29f   : > { %v483_v63 = vld [vmem:[#allocation3] sm:$0x1] }
 0x2a0   : > { %v498_v0 = vmul.f32 0.0625, %v496_v62  ;;  %v484_v1 = vmul.f32 0.0625, %v483_v63 }
 0x2a2   : > { %499 = vst.msk [vmem:[%s178_s23 + $0x1] sm:$0x1] %vm186_vm5, %v498_v0  ;;  %485 = vst.msk [vmem:[%s178_s23] sm:$0x1] %vm186_vm5, %v484_v1 }
 0x2a3 PF: > { %s12_s11 = sadd.s32 1, %s660_s11   ;;  %s737_s9 = smov %s656_s10 }
 0x2a4   : > { %p9_p5 = scmp.ge.s32.totalorder %s12_s11, 4   ;;  %s738_s10 = smov %s740_s12 }
 0x2a6   :  { %11 = sbr.rel (!%p9_p5) target bundleno = 2 (0x2), region = 69 }

</bundles_post_ra>
